<compile_context>
chip_gen: v7x
topology: tpu7x:2x2x1
jax: 0.10.0
libtpu: 0.0.40
codegen_flags: <defaults>
</compile_context>

<pallas_src>
import jax
import jax.numpy as jnp
from jax.experimental import pallas as pl
from jax.experimental.pallas import tpu as pltpu

IN_FEATURES = 84
OUT_FEATURES = 10


def f5_kernel(x_ref, w_ref, b_ref, o_ref):
    # Linear: z = x @ W + b   (W already transposed to (84, 10)).
    z = jnp.dot(x_ref[...], w_ref[...], preferred_element_type=jnp.float32)
    z = z + b_ref[...]                                           # (TILE_B, 10)

    # LogSoftmax along the last axis (numerically stable, all-f32 math).
    m = jnp.max(z, axis=-1, keepdims=True)                       # (TILE_B, 1)
    s = z - m
    lse = jnp.log(jnp.sum(jnp.exp(s), axis=-1, keepdims=True))   # (TILE_B, 1)
    o_ref[...] = (s - lse).astype(o_ref.dtype)


def f5_forward(x, w_t, b, *, tile_b=2048):
    """x: (B, 84) f32, w_t: (84, 10) f32, b: (1, 10) f32 -> (B, 10) log-probs."""
    B = x.shape[0]

    # Effective tile: multiple of 8, no larger than the (8-rounded) batch.
    min_padded = ((B + 7) // 8) * 8
    tb = max(8, min((tile_b // 8) * 8, min_padded))

    # Pad the batch up to a multiple of the tile so every grid step is full.
    padded_B = ((B + tb - 1) // tb) * tb
    if padded_B != B:
        x = jnp.pad(x, ((0, padded_B - B), (0, 0)))

    grid = (pl.cdiv(padded_B, tb),)

    cost = pl.CostEstimate(
        flops=2 * padded_B * IN_FEATURES * OUT_FEATURES,
        transcendentals=padded_B * (OUT_FEATURES + 1),       # exp per col + log
        bytes_accessed=(padded_B * (IN_FEATURES + OUT_FEATURES) * 4
                        + IN_FEATURES * OUT_FEATURES * 4
                        + OUT_FEATURES * 4),
    )

    out = pl.pallas_call(
        f5_kernel,
        out_shape=jax.ShapeDtypeStruct((padded_B, OUT_FEATURES), jnp.float32),
        grid=grid,
        in_specs=[
            # x: tiled along batch; last dim equals the full 84 (allowed).
            pl.BlockSpec((tb, IN_FEATURES), lambda i: (i, 0)),
            # weights / bias: resident across all grid steps.
            pl.BlockSpec((IN_FEATURES, OUT_FEATURES), lambda i: (0, 0)),
            pl.BlockSpec((1, OUT_FEATURES), lambda i: (0, 0)),
        ],
        out_specs=pl.BlockSpec((tb, OUT_FEATURES), lambda i: (i, 0)),
        compiler_params=pltpu.CompilerParams(
            dimension_semantics=("parallel",),
        ),
        cost_estimate=cost,
    )(x, w_t, b)

    return out[:B] if padded_B != B else out


def init_params(key):
    # Mimic nn.Linear default init: U(-1/sqrt(fan_in), 1/sqrt(fan_in)).
    k_w, k_b = jax.random.split(key)
    bound = 1.0 / jnp.sqrt(jnp.float32(IN_FEATURES))
    w = jax.random.uniform(k_w, (OUT_FEATURES, IN_FEATURES), jnp.float32,
                           minval=-bound, maxval=bound)
    b = jax.random.uniform(k_b, (OUT_FEATURES,), jnp.float32,
                           minval=-bound, maxval=bound)
    return w.T, b.reshape(1, OUT_FEATURES)   # pre-transpose weight for the kernel


if __name__ == "__main__":
    key = jax.random.PRNGKey(0)
    k_x, k_p = jax.random.split(key)

    batch = 8
    x = jax.random.normal(k_x, (batch, IN_FEATURES), jnp.float32)
    w_t, b = init_params(k_p)

    out = f5_forward(x, w_t, b)
    out = jax.block_until_ready(out)

    # Sanity check against plain-JAX reference.
    ref = jax.nn.log_softmax(x @ w_t + b, axis=-1)
    assert out.shape == (batch, OUT_FEATURES)
    assert jnp.allclose(out, ref, atol=1e-5, rtol=1e-5)

    # Also exercise the ragged-batch (padding) path with a non-multiple-of-8 B.
    x2 = jax.random.normal(k_x, (5, IN_FEATURES), jnp.float32)
    out2 = jax.block_until_ready(f5_forward(x2, w_t, b))
    ref2 = jax.nn.log_softmax(x2 @ w_t + b, axis=-1)
    assert out2.shape == (5, OUT_FEATURES)
    assert jnp.allclose(out2, ref2, atol=1e-5, rtol=1e-5)

    print("KERNEL_OK")
</pallas_src>

<mosaic_0001>
module attributes {stable_mosaic.version = 11 : i64} {
  func.func @f5_kernel(%arg0: i32, %arg1: memref<8x84xf32, #tpu.memory_space<vmem>>, %arg2: memref<84x10xf32, #tpu.memory_space<vmem>>, %arg3: memref<1x10xf32, #tpu.memory_space<vmem>>, %arg4: memref<8x10xf32, #tpu.memory_space<vmem>>) attributes {dimension_semantics = [#tpu.dimension_semantics<parallel>], iteration_bounds = array<i64: 1>, scalar_prefetch = 0 : i64, scratch_operands = 0 : i64, tpu.core_type = #tpu.core_type<tc>, window_params = [{transform_indices = @transform_0, window_bounds = array<i64: 8, 84>}, {pipeline_mode = #tpu.pipeline_mode<synchronous>, transform_indices = @transform_1, window_bounds = array<i64: 84, 10>}, {pipeline_mode = #tpu.pipeline_mode<synchronous>, transform_indices = @transform_2, window_bounds = array<i64: 1, 10>}, {transform_indices = @transform_3, window_bounds = array<i64: 8, 10>}]} {
    %c0 = arith.constant 0 : index
    %c0_0 = arith.constant 0 : index
    %0 = vector.load %arg1[%c0, %c0_0] : memref<8x84xf32, #tpu.memory_space<vmem>>, vector<8x84xf32>
    %c0_1 = arith.constant 0 : index
    %c0_2 = arith.constant 0 : index
    %1 = vector.load %arg2[%c0_1, %c0_2] : memref<84x10xf32, #tpu.memory_space<vmem>>, vector<84x10xf32>
    %cst = arith.constant dense<0.000000e+00> : vector<8x10xf32>
    %2 = tpu.matmul %0, %1, %cst {dimension_numbers = #tpu.dot_dimension_numbers<[1], [0], [0], [1], [0, 0, 1, 1], [], []>} : vector<8x84xf32>, vector<84x10xf32>, vector<8x10xf32> -> vector<8x10xf32>
    %c0_3 = arith.constant 0 : index
    %c0_4 = arith.constant 0 : index
    %3 = vector.load %arg3[%c0_3, %c0_4] : memref<1x10xf32, #tpu.memory_space<vmem>>, vector<1x10xf32>
    %4 = vector.broadcast %3 : vector<1x10xf32> to vector<8x10xf32>
    %5 = arith.addf %2, %4 : vector<8x10xf32>
    %cst_5 = arith.constant dense<0xFF800000> : vector<8xf32>
    %6 = vector.multi_reduction <maximumf>, %5, %cst_5 [1] : vector<8x10xf32> to vector<8xf32>
    %7 = vector.shape_cast %6 : vector<8xf32> to vector<8x1xf32>
    %8 = vector.broadcast %7 : vector<8x1xf32> to vector<8x10xf32>
    %9 = arith.subf %5, %8 : vector<8x10xf32>
    %10 = math.exp %9 : vector<8x10xf32>
    %cst_6 = arith.constant dense<0.000000e+00> : vector<8xf32>
    %11 = vector.multi_reduction <add>, %10, %cst_6 [1] : vector<8x10xf32> to vector<8xf32>
    %12 = vector.shape_cast %11 : vector<8xf32> to vector<8x1xf32>
    %13 = math.log %12 : vector<8x1xf32>
    %14 = vector.broadcast %13 : vector<8x1xf32> to vector<8x10xf32>
    %15 = arith.subf %9, %14 : vector<8x10xf32>
    %c0_7 = arith.constant 0 : index
    %c0_8 = arith.constant 0 : index
    %16 = vector.load %arg4[%c0_7, %c0_8] : memref<8x10xf32, #tpu.memory_space<vmem>>, vector<8x10xf32>
    tpu.vector_store %arg4[%c0_7, %c0_8], %15 {strides = array<i32>} : memref<8x10xf32, #tpu.memory_space<vmem>>, vector<8x10xf32>,
    return
  }
  func.func @transform_0(%arg0: i32) -> (i32, i32) {
    %c0_i32 = arith.constant 0 : i32
    %c0_i32_0 = arith.constant 0 : i32
    return %arg0, %c0_i32 : i32, i32
  }
  func.func @transform_1(%arg0: i32) -> (i32, i32) {
    %c0_i32 = arith.constant 0 : i32
    %c0_i32_0 = arith.constant 0 : i32
    %c0_i32_1 = arith.constant 0 : i32
    return %c0_i32, %c0_i32_0 : i32, i32
  }
  func.func @transform_2(%arg0: i32) -> (i32, i32) {
    %c0_i32 = arith.constant 0 : i32
    %c0_i32_0 = arith.constant 0 : i32
    %c0_i32_1 = arith.constant 0 : i32
    return %c0_i32, %c0_i32_0 : i32, i32
  }
  func.func @transform_3(%arg0: i32) -> (i32, i32) {
    %c0_i32 = arith.constant 0 : i32
    %c0_i32_0 = arith.constant 0 : i32
    return %arg0, %c0_i32 : i32, i32
  }
}

</mosaic_0001>

<bundles_post_ra>
// kernel: tpu_custom_call.1
= control target key start
LH: loop header
LB: loop body
LE: loop exit
PB: predicated region body
PF: predicated region fallthrough
CT: control target
= control target key end

     0   :  { %v227_v3 = vmov 0.0|0.0   ;;  %vm228_vm0 = vmmov 0   ;;  %v229_v6 = vmov 0.0   ;;  %s305_s0 = inlined_call_operand.vmem [shape: f32[8,84], index: 0, kind: input, shape index: {}]   ;;  %s306_s1 = inlined_call_operand.vmem [shape: f32[84,10], index: 1, kind: input, shape index: {}]   ;;  %s307_s2 = inlined_call_operand.vmem [shape: f32[1,10], index: 2, kind: input, shape index: {}]   ;;  %s308_s3 = inlined_call_operand.hbm [shape: f32[8,10], index: 3, kind: output, shape index: {}]  }
   0x1   :  { %v16_v0 = vld [vmem:[%s306_s1] sm:$0xff]  ;;  %v17_v1 = vld [vmem:[%s306_s1 + $0x8] sm:$0xff]  ;;  %v18_v2 = vld [vmem:[%s306_s1 + $0x10] sm:$0xff]  ;;  %180 = vmatprep.subr.bf16.mxu0 %v227_v3  ;;  %177 = vmatprep.mubr.msk.f32.mxu0 %vm228_vm0, %v229_v6 }
   0x2   :  { %v181_v4 = vpack.c.bf16 %v17_v1, %v16_v0  ;;  %v19_v5 = vld [vmem:[%s306_s1 + $0x18] sm:$0xff]  ;;  %v20_v8 = vld [vmem:[%s306_s1 + $0x20] sm:$0xff]  ;;  %v21_v9 = vld [vmem:[%s306_s1 + $0x28] sm:$0xff] }
   0x3   :  { %v184_v7 = vpack.c.bf16 %v19_v5, %v18_v2 }
   0x4   :  { %182 = vmatpush3.bf16.msra.mxu0 %v181_v4 }
   0x5   :  { %183 = vmatprep.subr.bf16.mxu0 %v227_v3 }
   0x6   :  { %8 = vsyncpa [#allocation3], 0  ;;  %v187_v10 = vpack.c.bf16 %v21_v9, %v20_v8  ;;  %v22_v11 = vld [vmem:[%s306_s1 + $0x30] sm:$0xff]  ;;  %v23_v12 = vld [vmem:[%s306_s1 + $0x38] sm:$0xff]  ;;  %vm38_vm1 = vcmask 1043456   ;;  %vm34_vm2 = vcmask 687104  }
   0x7   :  { %v190_v13 = vpack.c.bf16 %v23_v12, %v22_v11  ;;  %v24_v14 = vld [vmem:[%s306_s1 + $0x40] sm:$0xff]  ;;  %v25_v15 = vld [vmem:[%s306_s1 + $0x48] sm:$0xff]  ;;  %v26_v17 = vld [vmem:[%s306_s1 + $0x50] sm:$0xf]  ;;  %vm112_vm3 = vcmask 80896  }
   0x8   :  { %185 = vmatpush3.bf16.msra.mxu0 %v184_v7  ;;  %v193_v16 = vpack.c.bf16 %v25_v15, %v24_v14  ;;  %v15_v18 = vld [vmem:[%s305_s0] sm:$0xff]  ;;  %s230_s0 = smov [#allocation2]  }
   0x9   :  { %186 = vmatprep.subr.bf16.mxu0 %v227_v3  ;;  %v140_v19 = vld [vmem:[%s307_s2] ss:$0 sm:$0xff]  ;;  %s132_s1 = sshll.u32 %s230_s0, 4  ;;  %s133_s1 = int_to_ptr.vmem [resolvable:$true] %s132_s1 }
   0xa   :  { %s203_s2 = scalar_lea.vmem %s133_s1, 128  ;;  %p208_p1 = scmp.lt.s32.totalorder %s133_s1, %s133_s1 }
   0xb   :  { %p204_p0 = scmp.ne.s32.totalorder %s133_s1, %s203_s2  ;;  %p209_p2 = scmp.lt.s32.totalorder %s203_s2, %s203_s2 }
   0xc   :  { %188 = vmatpush3.bf16.msra.mxu0 %v187_v10 }
   0xd   :  { %189 = vmatprep.subr.bf16.mxu0 %v227_v3  ;;  %p210_p3 = por %p209_p2, %p208_p1 }
   0xf   :  { %p211_p4 = pnand %p210_p3, %p204_p0 }
  0x10   :  { %191 = vmatpush3.bf16.msra.mxu0 %v190_v13 }
  0x11   :  { %192 = vmatprep.subr.bf16.mxu0 %v227_v3 }
  0x14   :  { %194 = vmatpush3.bf16.msra.mxu0 %v193_v16 }
  0x15   :  { %175 = vmatprep.subr.mxu0 %v229_v6 }
  0x18   :  { %176 = vmatpush3.msk.msra.mxu0 %vm38_vm1, %v26_v17 }
  0x19   :  { %178 = vmatmul.mubr.msk.f32.vlgmr.msra.gmra.mrb[0].mxu0 %vm34_vm2, %v15_v18 }
  0xec   :  { %v108_v20 = vpop.f32.mrb[0].mxu0 }
  0xed   :  { %v109_v21 = vadd.f32 %v140_v19, %v108_v20  ;;  %v179_v22 = vpop.f32.mrb[1].mxu0 }
  0xef   :  { %v113_v23 = vsel %vm112_vm3, %v109_v21, -inf }
  0xf0   :  { %114 = vmax.xlane.f32.xlu0 %v113_v23 }
 0x17d   :  { %v115_v24 = vpop.xlane.xlu0 %114 }
 0x17e   :  { %v116_v25 = vsub.f32 %v109_v21, %v115_v24 }
 0x180   :  { %v117_v26 = vmul.f32 1.442695, %v116_v25 }
 0x182   :  { %199 = vpow2.f32 %v117_v26 }
 0x18c   :  { %v200_v27 = vpop.eup %199 }
 0x18d   :  { %v119_v28 = vsel %vm112_vm3, %v200_v27, 0.0 }
 0x18e   :  { %120 = vadd.xlane.f32.xlu0 %v119_v28 }
 0x21b   :  { %v121_v29 = vpop.xlane.xlu0 %120 }
 0x21c   :  { %201 = vlog2.f32 %v121_v29 }
 0x226   :  { %v202_v30 = vpop.eup %201 }
 0x227   :  { %v123_v31 = vmul.f32 0.6931472, %v202_v30 }
 0x229   :  { %v124_v32 = vsub.f32 %v116_v25, %v123_v31 }
 0x22b   :  { %125 = vst.msk [vmem:[#allocation2] sm:$0xff] %vm112_vm3, %v124_v32 }
 0x22c   :  { %214 = shalt.err (!%p211_p4)
}
 0x22d   :  { %s215_s13 = scalar_lea.hbm %s308_s3, 128 }
 0x22e   :  { %p216_p5 = scmp.ne.s32.totalorder %s308_s3, %s215_s13  ;;  %p219_p6 = scmp.lt.u32.totalorder %s215_s13, %s308_s3 }
 0x230   :  { %p221_p7 = pnand %p219_p6, %p216_p5 }
 0x232   :  { %224 = shalt.err (!%p221_p7)
}
 0x233   :  { %135 = dma.vmem_to_hbm [thread:$0]  %s133_s1, 128, %s308_s3, [#allocation3]  }
 0x234   :  { %225 = dma.done.wait [#allocation3], 128  }
 0x235   :  { %226 = vsyncadd [#allocation3], 4294967168 }
 0x236   :  { %139 = vsyncpa [#allocation3], 1 }

</bundles_post_ra>
